<compile_context>
chip_gen: v7x
topology: tpu7x:2x2x1
jax: 0.10.0
libtpu: 0.0.40
codegen_flags: <defaults>
</compile_context>

<pallas_src>
import math

import jax
import jax.numpy as jnp
from jax.experimental import pallas as pl
from jax.experimental.pallas import tpu as pltpu


def _max_readout_kernel(seq_ref, out_ref):
    # seq_ref: (TB, TN, D) input tile; out_ref: (TB, D) output tile, resident
    # across the reduction (k) grid axis (same block index for every k).
    k = pl.program_id(1)
    tile_max = jnp.max(seq_ref[...], axis=1)  # (TB, D), stays in input dtype

    @pl.when(k == 0)
    def _init():
        # Initialize from the first tile: dtype-agnostic (works for ints too).
        out_ref[...] = tile_max

    @pl.when(k != 0)
    def _combine():
        out_ref[...] = jnp.maximum(out_ref[...], tile_max)


def _sublane_multiple(itemsize):
    # Sub-32-bit dtypes pack along sublanes: 2 rows/sublane for bf16, 4 for int8.
    return {4: 8, 2: 16, 1: 32}.get(itemsize, 8)


def _lane_fold_factor(N, D):
    """Smallest r>1 with N % r == 0 and (r*D) % 128 == 0, else 1."""
    if D % 128 == 0 or D == 0:
        return 1
    need = 128 // math.gcd(D, 128)
    if need > 1 and N % need == 0:
        return need
    return 1


def _choose_tiles(B, N, D, itemsize, target_block_bytes):
    """Pick (TB, TN). TB / TN are sublane multiples dividing B / N (or the full
    dim). Blocks are grown toward target_block_bytes; TB only grows once the
    whole reduction axis fits, and we keep >= 2 parallel batch blocks when a
    valid candidate exists (megacore / dual-TC sharding)."""
    sub = _sublane_multiple(itemsize)
    row_bytes = max(1, D * itemsize)

    batch_tiles = sorted(
        {B} | ({d for d in range(sub, B + 1, sub) if B % d == 0} if B % sub == 0 else set()))
    n_tiles = sorted(
        {N} | ({d for d in range(sub, N + 1, sub) if N % d == 0} if N % sub == 0 else set()))

    tb = batch_tiles[0]  # smallest valid batch tile
    if tb * N * row_bytes <= target_block_bytes:
        # Whole reduction axis fits in one block: grow the batch tile instead.
        tn = N
        fitting = [t for t in batch_tiles if t * N * row_bytes <= target_block_bytes]
        preferred = [t for t in fitting if B // t >= 2]  # keep both TCs busy
        tb = max(preferred) if preferred else max(fitting)
    else:
        # Pick the largest reduction tile near the target for the minimal TB.
        fitting = [t for t in n_tiles if tb * t * row_bytes <= target_block_bytes]
        tn = max(fitting) if fitting else n_tiles[0]
    return tb, tn


def max_readout(seq, *, tb=None, tn=None, min_bytes_for_pallas=1 << 20):
    """Pallas equivalent of MaxReadout.forward: max over axis 1.

    seq: (B, N, D) array -> returns (B, D) array of the same dtype.
    """
    B, N, D = seq.shape
    itemsize = jnp.dtype(seq.dtype).itemsize
    total_bytes = B * N * D * itemsize

    # Tiny inputs: fixed pallas_call / pipeline overhead dominates -- let XLA
    # do the fused reduce.
    if total_bytes < min_bytes_for_pallas or N == 0:
        return jnp.max(seq, axis=1)

    # Lane-fold narrow D into 128-wide lanes when possible (cheap contiguous
    # reshape in the wrapper; groups are un-folded with a tiny max afterwards).
    r = _lane_fold_factor(N, D)
    x = seq if r == 1 else seq.reshape(B, N // r, r * D)
    Bp, Np, Dp = x.shape

    # Per-generation VMEM budget (v5e/v6e: 128 MiB physical -> ~8 MiB blocks;
    # v7x: 64 MiB physical -> ~4 MiB blocks).
    try:
        physical_vmem = int(pltpu.get_tpu_info().vmem_capacity_bytes)
    except Exception:  # conservative fallback works on every generation
        physical_vmem = 64 << 20
    target_block_bytes = max(1 << 20, min(8 << 20, physical_vmem // 16))

    if tb is None or tn is None:
        auto_tb, auto_tn = _choose_tiles(Bp, Np, Dp, itemsize, target_block_bytes)
        tb = auto_tb if tb is None else tb
        tn = auto_tn if tn is None else tn
    assert Bp % tb == 0 and Np % tn == 0, "tile sizes must divide (B, N)"

    in_block_bytes = tb * tn * Dp * itemsize
    out_block_bytes = tb * Dp * itemsize
    needed_vmem = 2 * in_block_bytes + 2 * out_block_bytes + (2 << 20)
    if needed_vmem > physical_vmem * 3 // 4:
        # Pathological shapes (e.g. huge prime N with no valid tiling) -- don't
        # risk a VMEM OOM, let XLA handle it.
        return jnp.max(seq, axis=1)
    vmem_limit = int(min(max(needed_vmem, 32 << 20), physical_vmem * 3 // 4))

    out = pl.pallas_call(
        _max_readout_kernel,
        out_shape=jax.ShapeDtypeStruct((Bp, Dp), x.dtype),
        grid_spec=pltpu.PrefetchScalarGridSpec(
            num_scalar_prefetch=0,
            # Batch axis parallel, reduction axis last and "arbitrary".
            grid=(Bp // tb, Np // tn),
            in_specs=[
                # Last two block dims are (TN, Dp): TN is a sublane multiple or
                # the full N; Dp is a multiple of 128 (folded) or the full D.
                pl.BlockSpec((tb, tn, Dp), lambda b, k: (b, k, 0)),
            ],
            # Output tile is resident across the reduction axis and doubles as
            # the accumulator (initialized at k == 0 from the first tile).
            out_specs=pl.BlockSpec((tb, Dp), lambda b, k: (b, 0)),
        ),
        compiler_params=pltpu.CompilerParams(
            dimension_semantics=("parallel", "arbitrary"),
            vmem_limit_bytes=vmem_limit,
        ),
    )(x)

    if r > 1:
        out = jnp.max(out.reshape(B, r, D), axis=1)
    return out


if __name__ == "__main__":
    key = jax.random.PRNGKey(0)
    k0, k1, k2, k3 = jax.random.split(key, 4)

    # 1) Spec-sized example (batch=2, seq=8, hidden=32); tiny -> XLA fallback.
    seq = jax.random.normal(k0, (2, 8, 32), dtype=jnp.float32)
    out = max_readout(seq)
    jax.block_until_ready(out)
    assert out.shape == (2, 32)
    assert jnp.allclose(out, jnp.max(seq, axis=1))

    # 2) Pallas path with an explicit multi-step reduction: tb=8, tn=8 -> grid
    #    (1, 4), exercising the k==0 init / k>0 maximum-combine in out_ref.
    seq2 = jax.random.normal(k1, (8, 32, 128), dtype=jnp.float32)
    out2 = max_readout(seq2, tb=8, tn=8, min_bytes_for_pallas=0)
    jax.block_until_ready(out2)
    assert jnp.array_equal(out2, jnp.max(seq2, axis=1))

    # 3) Same input through the automatic (VMEM-aware) tiling path.
    out2b = max_readout(seq2, min_bytes_for_pallas=0)
    jax.block_until_ready(out2b)
    assert jnp.array_equal(out2b, jnp.max(seq2, axis=1))

    # 4) bf16 with narrow D=64: lane folding r=2 -> kernel runs on (16, 24, 128)
    #    with dtype-aware (16-row) sublane handling; groups folded back outside.
    seq3 = jax.random.normal(k2, (16, 48, 64), dtype=jnp.float32).astype(jnp.bfloat16)
    out3 = max_readout(seq3, min_bytes_for_pallas=0)
    jax.block_until_ready(out3)
    assert jnp.array_equal(out3, jnp.max(seq3, axis=1))

    # 5) Integer dtype: first-tile init means no -inf / f32 identity is needed.
    seq4 = jax.random.randint(k3, (8, 16, 128), -1000, 1000, dtype=jnp.int32)
    out4 = max_readout(seq4, min_bytes_for_pallas=0)
    jax.block_until_ready(out4)
    assert jnp.array_equal(out4, jnp.max(seq4, axis=1))

    print("KERNEL_OK")
</pallas_src>

<mosaic_0001>
module attributes {stable_mosaic.version = 11 : i64} {
  func.func @_max_readout_kernel(%arg0: i32, %arg1: i32, %arg2: memref<8x8x128xf32, #tpu.memory_space<vmem>>, %arg3: memref<8x128xf32, #tpu.memory_space<vmem>>) attributes {dimension_semantics = [#tpu.dimension_semantics<parallel>, #tpu.dimension_semantics<arbitrary>], iteration_bounds = array<i64: 1, 4>, scalar_prefetch = 0 : i64, scratch_operands = 0 : i64, tpu.core_type = #tpu.core_type<tc>, window_params = [{transform_indices = @transform_0, window_bounds = array<i64: 8, 8, 128>}, {transform_indices = @transform_1, window_bounds = array<i64: 8, 128>}]} {
    %c0 = arith.constant 0 : index
    %c0_0 = arith.constant 0 : index
    %c0_1 = arith.constant 0 : index
    %0 = vector.load %arg2[%c0, %c0_0, %c0_1] : memref<8x8x128xf32, #tpu.memory_space<vmem>>, vector<8x8x128xf32>
    %cst = arith.constant dense<0xFF800000> : vector<8x128xf32>
    %1 = vector.multi_reduction <maximumf>, %0, %cst [1] : vector<8x8x128xf32> to vector<8x128xf32>
    %c0_i32 = arith.constant 0 : i32
    %2 = arith.cmpi eq, %arg1, %c0_i32 : i32
    %3 = arith.extui %2 : i1 to i32
    %c0_i32_2 = arith.constant 0 : i32
    %4 = arith.cmpi ne, %3, %c0_i32_2 : i32
    scf.if %4 {
      %c0_5 = arith.constant 0 : index
      %c0_6 = arith.constant 0 : index
      %8 = vector.load %arg3[%c0_5, %c0_6] : memref<8x128xf32, #tpu.memory_space<vmem>>, vector<8x128xf32>
      tpu.vector_store %arg3[%c0_5, %c0_6], %1 {strides = array<i32>} : memref<8x128xf32, #tpu.memory_space<vmem>>, vector<8x128xf32>,
    } else {
    }
    %c0_i32_3 = arith.constant 0 : i32
    %5 = arith.cmpi ne, %arg1, %c0_i32_3 : i32
    %6 = arith.extui %5 : i1 to i32
    %c0_i32_4 = arith.constant 0 : i32
    %7 = arith.cmpi ne, %6, %c0_i32_4 : i32
    scf.if %7 {
      %c0_5 = arith.constant 0 : index
      %c0_6 = arith.constant 0 : index
      %8 = vector.load %arg3[%c0_5, %c0_6] : memref<8x128xf32, #tpu.memory_space<vmem>>, vector<8x128xf32>
      %9 = arith.maximumf %8, %1 : vector<8x128xf32>
      %c0_7 = arith.constant 0 : index
      %c0_8 = arith.constant 0 : index
      %10 = vector.load %arg3[%c0_7, %c0_8] : memref<8x128xf32, #tpu.memory_space<vmem>>, vector<8x128xf32>
      tpu.vector_store %arg3[%c0_7, %c0_8], %9 {strides = array<i32>} : memref<8x128xf32, #tpu.memory_space<vmem>>, vector<8x128xf32>,
    } else {
    }
    return
  }
  func.func @transform_0(%arg0: i32, %arg1: i32) -> (i32, i32, i32) {
    %c0_i32 = arith.constant 0 : i32
    %c0_i32_0 = arith.constant 0 : i32
    return %arg0, %arg1, %c0_i32 : i32, i32, i32
  }
  func.func @transform_1(%arg0: i32, %arg1: i32) -> (i32, i32) {
    %c0_i32 = arith.constant 0 : i32
    %c0_i32_0 = arith.constant 0 : i32
    return %arg0, %c0_i32 : i32, i32
  }
}

</mosaic_0001>

<bundles_post_ra>
// kernel: tpu_custom_call.1
= control target key start
LH: loop header
LB: loop body
LE: loop exit
PB: predicated region body
PF: predicated region fallthrough
CT: control target
= control target key end

     0   :  { %6 = vsyncpa [#allocation3], 0  ;;  %s689_s0 = inlined_call_operand.hbm [shape: f32[8,32,128], index: 0, kind: input, shape index: {}]   ;;  %s690_s1 = inlined_call_operand.hbm [shape: f32[8,128], index: 1, kind: output, shape index: {}]  }
   0x1   :  { %8 = vsyncpa [#allocation3 + $0x1], 0 }
   0x2   :  { %9 = vsyncpa [#allocation4], 0  ;;  %s536_s6 = smov 0   ;;  %s538_s7 = smov 0  }
   0x3   :  { %s540_s8 = smov 0   ;;  %s542_s9 = smov 0  }
   0x4   :  { %s544_s10 = smov 0   ;;  %s546_s11 = smov 0  }
   0x5 LB: > { %s331_s12 = sadd.s32 4294967295, %s519_s11   ;;  %s24_s13 = sadd.s32 1, %s515_s10  ;;  %s519_s11 = sphi %s546_s11, %s15_s11   ;;  %s515_s10 = sphi %s544_s10, %s700_s10   ;;  %s511_s9 = sphi %s542_s9, %s699_s9   ;;  %s507_s8 = sphi %s540_s8, %s698_s8   ;;  %s503_s7 = sphi %s538_s7, %s697_s7   ;;  %s499_s6 = sphi %s536_s6, %s696_s6  }
   0x6   : > { %p25_p0 = scmp.ge.s32.totalorder %s24_s13, 4  ;;  %s36_s14 = sadd.s32 1, %s507_s8 }
   0x7   : > { %p43_p1 = scmp.ne.s32.totalorder %s507_s8, %s503_s7  ;;  %p44_p2 = scmp.eq.s32.totalorder %s519_s11, 0 }
   0x8   : > { %s702_s13 = smov (%p25_p0, %s24_s13), 0  ;;  %p49_p4 = scmp.ne.s32.totalorder %s503_s7, %s499_s6 }
   0x9   : > { %p572_p3 = por %p44_p2, %p43_p1  ;;  %s32_s16 = ssub.s32 %s515_s10, %s702_s13 }
   0xa   : > { %p50_p5 = scmp.eq.s32.totalorder %s331_s12, 0  ;;  %p34_p6 = scmp.eq.s32.totalorder %s32_s16, 0 }
   0xb   : > { %p354_p8 = scmp.lt.s32.totalorder %s519_s11, 4  ;;  %s99_s19 = sand.u32 1, %s507_s8  }
   0xc   : > { %p581_p7 = por %p50_p5, %p49_p4  ;;  %s335_s20 = sshll.u32 %s515_s10, 7 }
   0xd   : > { %s587_s18 = scalar_select %p34_p6, %s507_s8, %s36_s14  }
   0xe   : > { %s334_s21 = sshll.u32 %s99_s19, 6  ;;  %s594_s24 = scalar_lea.hbm %s689_s0, %s335_s20 }
   0xf   : > { %s103_s25 = scalar_lea.vmem [#allocation2], %s334_s21  ;;  %p598_p9 = pnand %p354_p8, %p572_p3 }
  0x10   : > { %s112_s26 = sshll.u32 %s103_s25, 4  ;;  %s605_s28 = scalar_lea.sflag [#allocation3], %s99_s19  ;;  %s602_s26 = int_to_ptr.vmem [resolvable:$true] %s112_s26 }
  0x11   : > { %s409_s29 = scalar_lea.hbm %s594_s24, 1024  ;;  %p411_p12 = pneg %p598_p9 }
  0x12   : > { %p410_p11 = scmp.ne.s32.totalorder %s594_s24, %s409_s29  ;;  %s414_s3 = scalar_lea.hbm %s689_s0, 4096 }
  0x13   : > { %p415_p1 = scmp.lt.u32.totalorder %s594_s24, %s689_s0  ;;  %p416_p2 = scmp.lt.u32.totalorder %s414_s3, %s409_s29 }
  0x14   : > { %p412_p13 = pnand %p411_p12, %p410_p11  ;;  %p418_p4 = scmp.lt.u32.totalorder %s409_s29, %s594_s24 }
  0x15   : > { %p417_p3 = por %p416_p2, %p415_p1 }
  0x16   : > { %p413_p0 = pneg %p412_p13 }
  0x17   : > { %p419_p5 = por %p418_p4, %p417_p3 }
  0x19   : > { %p420_p6 = pnand %p419_p5, %p413_p0 }
  0x1b   : > { %423 = shalt.err (!%p420_p6)
}
  0x1c   : > { %s424_s6 = scalar_lea.vmem %s602_s26, 1024  ;;  %s521_s14 = smov [#allocation2]  }
  0x1d   : > { %p425_p8 = scmp.ne.s32.totalorder %s602_s26, %s424_s6  ;;  %s429_s15 = sshll.u32 %s521_s14, 4  ;;  %s430_s15 = int_to_ptr.vmem [resolvable:$false] %s429_s15 }
  0x1e   : > { %s431_s16 = scalar_lea.vmem %s430_s15, 2048  ;;  %p432_p10 = scmp.lt.s32.totalorder %s602_s26, %s430_s15 }
  0x1f   : > { %p427_p11 = pnand %p425_p8, %p411_p12  ;;  %p433_p1 = scmp.lt.s32.totalorder %s431_s16, %s424_s6 }
  0x21   : > { %p428_p13 = pneg %p427_p11  ;;  %p434_p2 = por %p433_p1, %p432_p10 }
  0x23   : > { %p435_p3 = pnand %p434_p2, %p428_p13 }
  0x25   : > { %438 = shalt.err (!%p435_p3)
}
  0x26   : > { %s522_s19 = smov 512   ;;  %s523_s20 = smov 128  }
  0x27   : > { %s524_s21 = smov 8   ;;  %p120_p12 = scmp.lt.s32.totalorder %s519_s11, 5 }
  0x28   : > { %353 = dma.hbm_to_vmem [thread:$0]  (!%p598_p9), %s594_s24, 1024, %s602_s26, %s605_s28, %s522_s19, %s523_s20, %s524_s21  }
  0x29   : > { %p694_p0 = scmp.ge.s32.totalorder %s519_s11, 1 }
  0x2b   : > { %p121_p4 = pnand %p694_p0, %p120_p12 }
  0x2c   : > { %s126_s22 = sand.u32 (!%p121_p4), 1, %s503_s7  }
  0x2d   : > { %124 = sbr.rel (%p121_p4) target bundleno = 112 (0x70), region = 24  ;;  %s337_s23 = sshll.u32 (!%p121_p4), %s126_s22, 6 }
  0x2e   : > { %s127_s25 = scalar_lea.sflag (!%p121_p4), [#allocation3], %s126_s22  ;;  %s130_s29 = scalar_lea.vmem (!%p121_p4), [#allocation2], %s337_s23 }
  0x34   : > { %490 = dma.done.wait (%p581_p7), %s127_s25, 1024  }
  0x35   : > { %492 = vsyncadd (%p581_p7), %s127_s25, 4294966272  ;;  %v145_v0 = vld [vmem:[%s130_s29] sm:$0xff]  ;;  %v146_v1 = vld [vmem:[%s130_s29 + $0x8] sm:$0xff]  ;;  %p338_p7 = scmp.ne.s32.totalorder %s511_s9, 0 }
  0x36   : > { %v147_v2 = vld [vmem:[%s130_s29 + $0x10] sm:$0xff]  ;;  %v148_v3 = vld [vmem:[%s130_s29 + $0x18] sm:$0xff]  ;;  %v149_v4 = vld [vmem:[%s130_s29 + $0x20] sm:$0xff]  ;;  %v153_v6 = vrot.slane %v145_v0, 4  ;;  %v159_v7 = vrot.slane %v146_v1, 4  ;;  %vm213_vm0 = vcmask (!%p338_p7), 1041409  }
  0x37   : > { %v150_v5 = vld [vmem:[%s130_s29 + $0x28] sm:$0xff]  ;;  %v165_v8 = vrot.slane %v147_v2, 4  ;;  %v151_v9 = vld [vmem:[%s130_s29 + $0x30] sm:$0xff]  ;;  %v152_v10 = vld [vmem:[%s130_s29 + $0x38] sm:$0xff]  ;;  %v171_v11 = vrot.slane %v148_v3, 4  ;;  %v177_v12 = vrot.slane %v149_v4, 4 }
  0x38   : > { %v183_v13 = vrot.slane %v150_v5, 4  ;;  %v154_v14 = vmax.f32 %v145_v0, %v153_v6  ;;  %v160_v15 = vmax.f32 %v146_v1, %v159_v7  ;;  %v189_v17 = vrot.slane %v151_v9, 4 }
  0x39   : > { %v166_v16 = vmax.f32 %v147_v2, %v165_v8  ;;  %v172_v18 = vmax.f32 %v148_v3, %v171_v11  ;;  %v178_v19 = vmax.f32 %v149_v4, %v177_v12  ;;  %v195_v21 = vrot.slane %v152_v10, 4 }
  0x3a   : > { %v184_v20 = vmax.f32 %v150_v5, %v183_v13  ;;  %v155_v22 = vrot.slane %v154_v14, 2  ;;  %v161_v23 = vrot.slane %v160_v15, 2  ;;  %v190_v25 = vmax.f32 %v151_v9, %v189_v17 }
  0x3b   : > { %v167_v24 = vrot.slane %v166_v16, 2  ;;  %v173_v26 = vrot.slane %v172_v18, 2  ;;  %v179_v27 = vrot.slane %v178_v19, 2  ;;  %v196_v29 = vmax.f32 %v152_v10, %v195_v21 }
  0x3c   : > { %v185_v28 = vrot.slane %v184_v20, 2  ;;  %v156_v30 = vmax.f32 %v154_v14, %v155_v22  ;;  %v162_v31 = vmax.f32 %v160_v15, %v161_v23  ;;  %v191_v33 = vrot.slane %v190_v25, 2 }
  0x3d   : > { %v168_v32 = vmax.f32 %v166_v16, %v167_v24  ;;  %v174_v34 = vmax.f32 %v172_v18, %v173_v26  ;;  %v180_v35 = vmax.f32 %v178_v19, %v179_v27  ;;  %v197_v37 = vrot.slane %v196_v29, 2  ;;  %204 = sbr.rel (%p338_p7) target bundleno = 75 (0x4b), region = 32 }
  0x3e   : > { %v186_v36 = vmax.f32 %v184_v20, %v185_v28  ;;  %v157_v38 = vrot.slane %v156_v30, 1  ;;  %v163_v39 = vrot.slane %v162_v31, 1  ;;  %v192_v41 = vmax.f32 %v190_v25, %v191_v33 }
  0x3f   : > { %v169_v40 = vrot.slane %v168_v32, 1  ;;  %v175_v42 = vrot.slane %v174_v34, 1  ;;  %v181_v43 = vrot.slane %v180_v35, 1  ;;  %v198_v45 = vmax.f32 %v196_v29, %v197_v37 }
  0x40   : > { %v187_v44 = vrot.slane %v186_v36, 1  ;;  %v158_v46 = vmax.f32 %v156_v30, %v157_v38  ;;  %v164_v47 = vmax.f32 %v162_v31, %v163_v39  ;;  %v193_v49 = vrot.slane %v192_v41, 1 }
  0x41   : > { %v170_v48 = vmax.f32 %v168_v32, %v169_v40  ;;  %v176_v50 = vmax.f32 %v174_v34, %v175_v42  ;;  %v182_v51 = vmax.f32 %v180_v35, %v181_v43  ;;  %v199_v53 = vrot.slane %v198_v45, 1 }
  0x42   : > { %v188_v52 = vmax.f32 %v186_v36, %v187_v44  ;;  %v194_v54 = vmax.f32 %v192_v41, %v193_v49  ;;  %vm215_vm1 = vcmask (!%p338_p7), 1042434   ;;  %vm217_vm2 = vcmask (!%p338_p7), 1043459  }
  0x43   : > { %v200_v55 = vmax.f32 %v198_v45, %v199_v53  ;;  %v214_v56 = vsel (!%p338_p7), %vm213_vm0, %v164_v47, %v158_v46  ;;  %vm219_vm3 = vcmask (!%p338_p7), 1044484   ;;  %vm221_vm4 = vcmask (!%p338_p7), 1045509  }
  0x44   : > { %v216_v57 = vsel %vm215_vm1, %v170_v48, %v214_v56  ;;  %vm223_vm5 = vcmask 1046534   ;;  %vm225_vm6 = vcmask 1047559  }
  0x45   : > { %v218_v58 = vsel %vm217_vm2, %v176_v50, %v216_v57 }
  0x46   : > { %v220_v59 = vsel %vm219_vm3, %v182_v51, %v218_v58 }
  0x47   : > { %v222_v60 = vsel %vm221_vm4, %v188_v52, %v220_v59 }
  0x48   : > { %v224_v61 = vsel %vm223_vm5, %v194_v54, %v222_v60 }
  0x49   : > { %v226_v62 = vsel %vm225_vm6, %v200_v55, %v224_v61 }
  0x4a   : > { %228 = vst [vmem:[#allocation5] sm:$0xff] %v226_v62 }
  0x4b PF: > { %p339_p9 = scmp.eq.s32.totalorder %s511_s9, 0 }
  0x4c   : > { %vm242_vm7 = vcmask (!%p339_p9), 1041409   ;;  %vm244_vm8 = vcmask (!%p339_p9), 1042434   ;;  %vm246_vm9 = vcmask (!%p339_p9), 1043459   ;;  %vm248_vm10 = vcmask (!%p339_p9), 1044484  }
  0x4d   : > { %232 = sbr.rel (%p339_p9) target bundleno = 87 (0x57), region = 36  ;;  %v243_v63 = vsel (!%p339_p9), %vm242_vm7, %v164_v47, %v158_v46  ;;  %vm250_vm11 = vcmask (!%p339_p9), 1045509   ;;  %vm252_vm12 = vcmask (!%p339_p9), 1046534   ;;  %vm254_vm13 = vcmask (!%p339_p9), 1047559  }
  0x4e   : > { %v245_v0 = vsel (!%p339_p9), %vm244_vm8, %v170_v48, %v243_v63 }
  0x4f   : > { %v247_v1 = vsel (!%p339_p9), %vm246_vm9, %v176_v50, %v245_v0 }
  0x50   : > { %v249_v2 = vsel (!%p339_p9), %vm248_vm10, %v182_v51, %v247_v1 }
  0x51   : > { %v233_v3 = vld [vmem:[#allocation5] sm:$0xff] (!%p339_p9)  ;;  %v251_v4 = vsel (!%p339_p9), %vm250_vm11, %v188_v52, %v249_v2 }
  0x52   : > { %v253_v5 = vsel (!%p339_p9), %vm252_vm12, %v194_v54, %v251_v4 }
  0x53   : > { %v255_v6 = vsel (!%p339_p9), %vm254_vm13, %v200_v55, %v253_v5 }
  0x54   : > { %v257_v7 = vmax.f32 %v233_v3, %v255_v6 }
  0x56   : > { %258 = vst [vmem:[#allocation5] sm:$0xff] %v257_v7 }
  0x57 PF: > { %p645_p10 = scmp.eq.s32.totalorder %s331_s12, 3  ;;  %s525_s17 = smov [#allocation5]  }
  0x58   : > { %s268_s24 = sshll.u32 %s525_s17, 4  ;;  %s269_s24 = int_to_ptr.vmem [resolvable:$true] %s268_s24 }
  0x59   : > { %s439_s26 = scalar_lea.vmem %s269_s24, 128  ;;  %p446_p11 = scmp.lt.s32.totalorder %s269_s24, %s269_s24 }
  0x5a   : > { %p440_p5 = scmp.ne.s32.totalorder %s269_s24, %s439_s26  ;;  %p447_p13 = scmp.lt.s32.totalorder %s439_s26, %s439_s26 }
  0x5c   : > { %p441_p6 = pnand %p440_p5, %p645_p10  ;;  %p448_p1 = por %p447_p13, %p446_p11 }
  0x5e   : > { %p442_p8 = pneg %p441_p6 }
  0x60   : > { %p449_p2 = pnand %p448_p1, %p442_p8 }
  0x62   : > { %452 = shalt.err (!%p449_p2)
}
  0x63   : > { %s453_s12 = scalar_lea.hbm %s690_s1, 128 }
  0x64   : > { %p454_p3 = scmp.ne.s32.totalorder %s690_s1, %s453_s12  ;;  %p459_p4 = scmp.lt.u32.totalorder %s453_s12, %s690_s1 }
  0x66   : > { %p455_p12 = pnand %p454_p3, %p645_p10 }
  0x68   : > { %p456_p0 = pneg %p455_p12 }
  0x6a   : > { %p461_p7 = pnand %p459_p4, %p456_p0 }
  0x6c   : > { %464 = shalt.err (!%p461_p7)
}
  0x6d   : > { %347 = dma.vmem_to_hbm [thread:$0]  (%p645_p10), %s269_s24, 128, %s690_s1, [#allocation4]  }
  0x6e   : > { %494 = dma.done.wait (%p645_p10), [#allocation4], 128  }
  0x6f   : > { %496 = vsyncadd (%p645_p10), [#allocation4], 4294967168 }
  0x70 PF: > { %s15_s11 = sadd.s32 1, %s519_s11   ;;  %s696_s6 = smov %s503_s7 }
  0x71   : > { %p12_p9 = scmp.ge.s32.totalorder %s15_s11, 6   ;;  %s697_s7 = smov %s507_s8 }
  0x72   : > { %s698_s8 = smov %s587_s18  ;;  %s699_s9 = smov %s515_s10 }
  0x73   : > { %s700_s10 = smov %s702_s13  ;;  %14 = sbr.rel (!%p12_p9) target bundleno = 5 (0x5), region = 70 }
  0x7a   :  { %281 = vsyncpa [#allocation3], 1 }
  0x7b   :  { %283 = vsyncpa [#allocation3 + $0x1], 1 }
  0x7c   :  { %284 = vsyncpa [#allocation4], 1 }
  0x7d   :  { %286 = vsyncpa [#allocation4 + $0x1], 1 }

</bundles_post_ra>
